<compile_context>
chip_gen: v5e
topology: v5e:2x2
jax: 0.10.0
libtpu: 0.0.40
codegen_flags: <defaults>
</compile_context>

<pallas_src>
import jax
import jax.numpy as jnp
from jax.experimental import pallas as pl
from jax.experimental.pallas import tpu as pltpu

LANE = 128                         # lane width: hidden/output dims padded to this
LOGICAL_DIMS = (128, 40, 16, 7)    # logical layer widths of WineClassifier


def _round_up(n, m):
    return ((n + m - 1) // m) * m


def _mlp_kernel(x_ref, w1_ref, b1_ref, w2_ref, b2_ref,
                w3_ref, b3_ref, w4_ref, b4_ref, o_ref):
    # Fused 4-layer MLP on one batch tile. All weights are lane-padded to 128
    # and bf16; matmul accumulation is f32. Intermediates never touch HBM.
    h = jnp.dot(x_ref[...].astype(jnp.bfloat16), w1_ref[...],
                preferred_element_type=jnp.float32) + b1_ref[...]
    h = jnp.maximum(h, 0.0)
    # dropout(p=0.2): identity in eval mode
    h = jnp.dot(h.astype(jnp.bfloat16), w2_ref[...],
                preferred_element_type=jnp.float32) + b2_ref[...]
    h = jnp.maximum(h, 0.0)
    h = jnp.dot(h.astype(jnp.bfloat16), w3_ref[...],
                preferred_element_type=jnp.float32) + b3_ref[...]
    h = jnp.maximum(h, 0.0)
    out = jnp.dot(h.astype(jnp.bfloat16), w4_ref[...],
                  preferred_element_type=jnp.float32) + b4_ref[...]
    o_ref[...] = out.astype(o_ref.dtype)   # lane-dense (TILE_B, 128) store


def wine_classifier_forward(x, padded_params, *, tile_b=512):
    """x: [B, input_dim] float32. padded_params: lane-padded bf16 weights /
    f32 biases from pad_params(). Returns [B, 7] float32 logits."""
    B, input_dim = x.shape
    w1, b1 = padded_params["w1"], padded_params["b1"]
    w2, b2 = padded_params["w2"], padded_params["b2"]
    w3, b3 = padded_params["w3"], padded_params["b3"]
    w4, b4 = padded_params["w4"], padded_params["b4"]
    out_pad = w4.shape[1]              # 128 (lane-padded logits)
    out_dim = LOGICAL_DIMS[-1]         # 7

    # Batch tiling: sublane dim must be a multiple of 8; pad B up if needed.
    # tile_b=512 keeps well under v7x's 64 MiB VMEM while hitting the
    # large-tile sweet spot on v5e/v6e.
    tile_b = min(tile_b, _round_up(B, 8))
    b_pad = _round_up(B, tile_b)
    if b_pad != B:
        x = jnp.pad(x, ((0, b_pad - B), (0, 0)))
    grid = (b_pad // tile_b,)

    x_spec = pl.BlockSpec((tile_b, input_dim), lambda i: (i, 0))
    const = lambda a: pl.BlockSpec(a.shape, lambda i: (0,) * a.ndim)  # VMEM-resident
    out_spec = pl.BlockSpec((tile_b, out_pad), lambda i: (i, 0))

    weight_bytes = sum(int(a.size) * a.dtype.itemsize
                       for a in (w1, b1, w2, b2, w3, b3, w4, b4))
    cost = pl.CostEstimate(
        flops=2 * b_pad * (input_dim * LANE + 3 * LANE * LANE),
        transcendentals=0,
        bytes_accessed=b_pad * (input_dim + out_pad) * 4 + weight_bytes)

    out = pl.pallas_call(
        _mlp_kernel,
        out_shape=jax.ShapeDtypeStruct((b_pad, out_pad), jnp.float32),
        grid_spec=pltpu.PrefetchScalarGridSpec(
            num_scalar_prefetch=0,
            grid=grid,
            in_specs=[x_spec,
                      const(w1), const(b1),
                      const(w2), const(b2),
                      const(w3), const(b3),
                      const(w4), const(b4)],
            out_specs=out_spec),
        compiler_params=pltpu.CompilerParams(
            dimension_semantics=("parallel",)),
        cost_estimate=cost,
    )(x, w1, b1, w2, b2, w3, b3, w4, b4)
    return out[:B, :out_dim]


def init_params(key, input_dim):
    """Deterministic init mimicking nn.Linear default (uniform +/- 1/sqrt(fan_in)).
    Weights stored as [in, out] (transpose of PyTorch's [out, in])."""
    dims = [(input_dim, 128), (128, 40), (40, 16), (16, 7)]
    params = {}
    for i, (fan_in, fan_out) in enumerate(dims, start=1):
        key, kw, kb = jax.random.split(key, 3)
        bound = 1.0 / jnp.sqrt(float(fan_in))
        params[f"w{i}"] = jax.random.uniform(
            kw, (fan_in, fan_out), jnp.float32, -bound, bound)
        params[f"b{i}"] = jax.random.uniform(
            kb, (1, fan_out), jnp.float32, -bound, bound)
    return params


def pad_params(params):
    """Zero-pad hidden/output widths up to 128 lanes (math-identical: padded
    columns stay exactly zero through bias/ReLU) and cast weights to bf16."""
    padded = {}
    for i in range(1, 5):
        w, b = params[f"w{i}"], params[f"b{i}"]
        fan_in, fan_out = w.shape
        in_pad = fan_in if i == 1 else LANE   # previous layer's padded width
        wp = jnp.zeros((in_pad, LANE), jnp.float32).at[:fan_in, :fan_out].set(w)
        bp = jnp.zeros((1, LANE), jnp.float32).at[:, :fan_out].set(b)
        padded[f"w{i}"] = wp.astype(jnp.bfloat16)
        padded[f"b{i}"] = bp                   # biases stay f32 (f32 accum path)
    return padded


def reference_forward(x, params):
    """Pure-JAX reference matching the kernel numerics: bf16 matmul operands,
    f32 accumulation, f32 bias/ReLU, eval-mode dropout (identity)."""
    h = x
    for i in range(1, 5):
        w = params[f"w{i}"].astype(jnp.bfloat16)
        h = jnp.dot(h.astype(jnp.bfloat16), w,
                    preferred_element_type=jnp.float32) + params[f"b{i}"]
        if i < 4:
            h = jnp.maximum(h, 0.0)
    return h


if __name__ == "__main__":
    key = jax.random.PRNGKey(0)
    B, input_dim = 8, 16
    kx, kp = jax.random.split(key)
    x = jax.random.normal(kx, (B, input_dim), jnp.float32)
    params = init_params(kp, input_dim)
    kernel_params = pad_params(params)

    out = wine_classifier_forward(x, kernel_params)
    out = jax.block_until_ready(out)

    ref = reference_forward(x, params)
    assert out.shape == (B, 7)
    assert jnp.allclose(out, ref, atol=3e-2, rtol=3e-2), \
        float(jnp.max(jnp.abs(out - ref)))
    print("KERNEL_OK")
</pallas_src>

<mosaic_0001>
module attributes {stable_mosaic.version = 11 : i64} {
  func.func @_mlp_kernel(%arg0: i32, %arg1: memref<8x16xf32, #tpu.memory_space<vmem>>, %arg2: memref<16x128xbf16, #tpu.memory_space<vmem>>, %arg3: memref<1x128xf32, #tpu.memory_space<vmem>>, %arg4: memref<128x128xbf16, #tpu.memory_space<vmem>>, %arg5: memref<1x128xf32, #tpu.memory_space<vmem>>, %arg6: memref<128x128xbf16, #tpu.memory_space<vmem>>, %arg7: memref<1x128xf32, #tpu.memory_space<vmem>>, %arg8: memref<128x128xbf16, #tpu.memory_space<vmem>>, %arg9: memref<1x128xf32, #tpu.memory_space<vmem>>, %arg10: memref<8x128xf32, #tpu.memory_space<vmem>>) attributes {dimension_semantics = [#tpu.dimension_semantics<parallel>], iteration_bounds = array<i64: 1>, scalar_prefetch = 0 : i64, scratch_operands = 0 : i64, tpu.core_type = #tpu.core_type<tc>, window_params = [{transform_indices = @transform_0, window_bounds = array<i64: 8, 16>}, {pipeline_mode = #tpu.pipeline_mode<synchronous>, transform_indices = @transform_1, window_bounds = array<i64: 16, 128>}, {pipeline_mode = #tpu.pipeline_mode<synchronous>, transform_indices = @transform_2, window_bounds = array<i64: 1, 128>}, {pipeline_mode = #tpu.pipeline_mode<synchronous>, transform_indices = @transform_3, window_bounds = array<i64: 128, 128>}, {pipeline_mode = #tpu.pipeline_mode<synchronous>, transform_indices = @transform_4, window_bounds = array<i64: 1, 128>}, {pipeline_mode = #tpu.pipeline_mode<synchronous>, transform_indices = @transform_5, window_bounds = array<i64: 128, 128>}, {pipeline_mode = #tpu.pipeline_mode<synchronous>, transform_indices = @transform_6, window_bounds = array<i64: 1, 128>}, {pipeline_mode = #tpu.pipeline_mode<synchronous>, transform_indices = @transform_7, window_bounds = array<i64: 128, 128>}, {pipeline_mode = #tpu.pipeline_mode<synchronous>, transform_indices = @transform_8, window_bounds = array<i64: 1, 128>}, {transform_indices = @transform_9, window_bounds = array<i64: 8, 128>}]} {
    %c0 = arith.constant 0 : index
    %c0_0 = arith.constant 0 : index
    %0 = vector.load %arg1[%c0, %c0_0] : memref<8x16xf32, #tpu.memory_space<vmem>>, vector<8x16xf32>
    %1 = arith.truncf %0 : vector<8x16xf32> to vector<8x16xbf16>
    %c0_1 = arith.constant 0 : index
    %c0_2 = arith.constant 0 : index
    %2 = vector.load %arg2[%c0_1, %c0_2] : memref<16x128xbf16, #tpu.memory_space<vmem>>, vector<16x128xbf16>
    %cst = arith.constant dense<0.000000e+00> : vector<8x128xf32>
    %3 = tpu.matmul %1, %2, %cst {dimension_numbers = #tpu.dot_dimension_numbers<[1], [0], [0], [1], [0, 0, 1, 1], [], []>} : vector<8x16xbf16>, vector<16x128xbf16>, vector<8x128xf32> -> vector<8x128xf32>
    %c0_3 = arith.constant 0 : index
    %c0_4 = arith.constant 0 : index
    %4 = vector.load %arg3[%c0_3, %c0_4] : memref<1x128xf32, #tpu.memory_space<vmem>>, vector<1x128xf32>
    %5 = vector.broadcast %4 : vector<1x128xf32> to vector<8x128xf32>
    %6 = arith.addf %3, %5 : vector<8x128xf32>
    %cst_5 = arith.constant 0.000000e+00 : f32
    %7 = vector.broadcast %cst_5 : f32 to vector<8x128xf32>
    %8 = arith.maximumf %6, %7 : vector<8x128xf32>
    %9 = arith.truncf %8 : vector<8x128xf32> to vector<8x128xbf16>
    %c0_6 = arith.constant 0 : index
    %c0_7 = arith.constant 0 : index
    %10 = vector.load %arg4[%c0_6, %c0_7] : memref<128x128xbf16, #tpu.memory_space<vmem>>, vector<128x128xbf16>
    %cst_8 = arith.constant dense<0.000000e+00> : vector<8x128xf32>
    %11 = tpu.matmul %9, %10, %cst_8 {dimension_numbers = #tpu.dot_dimension_numbers<[1], [0], [0], [1], [0, 0, 1, 1], [], []>} : vector<8x128xbf16>, vector<128x128xbf16>, vector<8x128xf32> -> vector<8x128xf32>
    %c0_9 = arith.constant 0 : index
    %c0_10 = arith.constant 0 : index
    %12 = vector.load %arg5[%c0_9, %c0_10] : memref<1x128xf32, #tpu.memory_space<vmem>>, vector<1x128xf32>
    %13 = vector.broadcast %12 : vector<1x128xf32> to vector<8x128xf32>
    %14 = arith.addf %11, %13 : vector<8x128xf32>
    %cst_11 = arith.constant 0.000000e+00 : f32
    %15 = vector.broadcast %cst_11 : f32 to vector<8x128xf32>
    %16 = arith.maximumf %14, %15 : vector<8x128xf32>
    %17 = arith.truncf %16 : vector<8x128xf32> to vector<8x128xbf16>
    %c0_12 = arith.constant 0 : index
    %c0_13 = arith.constant 0 : index
    %18 = vector.load %arg6[%c0_12, %c0_13] : memref<128x128xbf16, #tpu.memory_space<vmem>>, vector<128x128xbf16>
    %cst_14 = arith.constant dense<0.000000e+00> : vector<8x128xf32>
    %19 = tpu.matmul %17, %18, %cst_14 {dimension_numbers = #tpu.dot_dimension_numbers<[1], [0], [0], [1], [0, 0, 1, 1], [], []>} : vector<8x128xbf16>, vector<128x128xbf16>, vector<8x128xf32> -> vector<8x128xf32>
    %c0_15 = arith.constant 0 : index
    %c0_16 = arith.constant 0 : index
    %20 = vector.load %arg7[%c0_15, %c0_16] : memref<1x128xf32, #tpu.memory_space<vmem>>, vector<1x128xf32>
    %21 = vector.broadcast %20 : vector<1x128xf32> to vector<8x128xf32>
    %22 = arith.addf %19, %21 : vector<8x128xf32>
    %cst_17 = arith.constant 0.000000e+00 : f32
    %23 = vector.broadcast %cst_17 : f32 to vector<8x128xf32>
    %24 = arith.maximumf %22, %23 : vector<8x128xf32>
    %25 = arith.truncf %24 : vector<8x128xf32> to vector<8x128xbf16>
    %c0_18 = arith.constant 0 : index
    %c0_19 = arith.constant 0 : index
    %26 = vector.load %arg8[%c0_18, %c0_19] : memref<128x128xbf16, #tpu.memory_space<vmem>>, vector<128x128xbf16>
    %cst_20 = arith.constant dense<0.000000e+00> : vector<8x128xf32>
    %27 = tpu.matmul %25, %26, %cst_20 {dimension_numbers = #tpu.dot_dimension_numbers<[1], [0], [0], [1], [0, 0, 1, 1], [], []>} : vector<8x128xbf16>, vector<128x128xbf16>, vector<8x128xf32> -> vector<8x128xf32>
    %c0_21 = arith.constant 0 : index
    %c0_22 = arith.constant 0 : index
    %28 = vector.load %arg9[%c0_21, %c0_22] : memref<1x128xf32, #tpu.memory_space<vmem>>, vector<1x128xf32>
    %29 = vector.broadcast %28 : vector<1x128xf32> to vector<8x128xf32>
    %30 = arith.addf %27, %29 : vector<8x128xf32>
    %c0_23 = arith.constant 0 : index
    %c0_24 = arith.constant 0 : index
    %31 = vector.load %arg10[%c0_23, %c0_24] : memref<8x128xf32, #tpu.memory_space<vmem>>, vector<8x128xf32>
    tpu.vector_store %arg10[%c0_23, %c0_24], %30 {strides = array<i32>} : memref<8x128xf32, #tpu.memory_space<vmem>>, vector<8x128xf32>,
    return
  }
  func.func @transform_0(%arg0: i32) -> (i32, i32) {
    %c0_i32 = arith.constant 0 : i32
    %c0_i32_0 = arith.constant 0 : i32
    return %arg0, %c0_i32 : i32, i32
  }
  func.func @transform_1(%arg0: i32) -> (i32, i32) {
    %c0_i32 = arith.constant 0 : i32
    %c0_i32_0 = arith.constant 0 : i32
    %c0_i32_1 = arith.constant 0 : i32
    return %c0_i32, %c0_i32_0 : i32, i32
  }
  func.func @transform_2(%arg0: i32) -> (i32, i32) {
    %c0_i32 = arith.constant 0 : i32
    %c0_i32_0 = arith.constant 0 : i32
    %c0_i32_1 = arith.constant 0 : i32
    return %c0_i32, %c0_i32_0 : i32, i32
  }
  func.func @transform_3(%arg0: i32) -> (i32, i32) {
    %c0_i32 = arith.constant 0 : i32
    %c0_i32_0 = arith.constant 0 : i32
    %c0_i32_1 = arith.constant 0 : i32
    return %c0_i32, %c0_i32_0 : i32, i32
  }
  func.func @transform_4(%arg0: i32) -> (i32, i32) {
    %c0_i32 = arith.constant 0 : i32
    %c0_i32_0 = arith.constant 0 : i32
    %c0_i32_1 = arith.constant 0 : i32
    return %c0_i32, %c0_i32_0 : i32, i32
  }
  func.func @transform_5(%arg0: i32) -> (i32, i32) {
    %c0_i32 = arith.constant 0 : i32
    %c0_i32_0 = arith.constant 0 : i32
    %c0_i32_1 = arith.constant 0 : i32
    return %c0_i32, %c0_i32_0 : i32, i32
  }
  func.func @transform_6(%arg0: i32) -> (i32, i32) {
    %c0_i32 = arith.constant 0 : i32
    %c0_i32_0 = arith.constant 0 : i32
    %c0_i32_1 = arith.constant 0 : i32
    return %c0_i32, %c0_i32_0 : i32, i32
  }
  func.func @transform_7(%arg0: i32) -> (i32, i32) {
    %c0_i32 = arith.constant 0 : i32
    %c0_i32_0 = arith.constant 0 : i32
    %c0_i32_1 = arith.constant 0 : i32
    return %c0_i32, %c0_i32_0 : i32, i32
  }
  func.func @transform_8(%arg0: i32) -> (i32, i32) {
    %c0_i32 = arith.constant 0 : i32
    %c0_i32_0 = arith.constant 0 : i32
    %c0_i32_1 = arith.constant 0 : i32
    return %c0_i32, %c0_i32_0 : i32, i32
  }
  func.func @transform_9(%arg0: i32) -> (i32, i32) {
    %c0_i32 = arith.constant 0 : i32
    %c0_i32_0 = arith.constant 0 : i32
    return %arg0, %c0_i32 : i32, i32
  }
}

</mosaic_0001>

<bundles_post_ra>
// kernel: tpu_custom_call.1
= control target key start
LH: loop header
LB: loop body
LE: loop exit
PB: predicated region body
PF: predicated region fallthrough
CT: control target
= control target key end

     0   :  { %14 = vsyncpa [#allocation3], 0  ;;  %s788_s0 = inlined_call_operand.hbm [shape: f32[8,16], index: 0, kind: input, shape index: {}]   ;;  %s789_s1 = inlined_call_operand.hbm [shape: bf16[16,128], index: 1, kind: input, shape index: {}]   ;;  %s790_s2 = inlined_call_operand.vmem [shape: f32[1,128], index: 2, kind: input, shape index: {}]   ;;  %s791_s3 = inlined_call_operand.hbm [shape: bf16[128,128], index: 3, kind: input, shape index: {}]   ;;  %s792_s4 = inlined_call_operand.vmem [shape: f32[1,128], index: 4, kind: input, shape index: {}]   ;;  %s793_s5 = inlined_call_operand.hbm [shape: bf16[128,128], index: 5, kind: input, shape index: {}]   ;;  %s794_s6 = inlined_call_operand.vmem [shape: f32[1,128], index: 6, kind: input, shape index: {}]   ;;  %s795_s7 = inlined_call_operand.hbm [shape: bf16[128,128], index: 7, kind: input, shape index: {}]   ;;  %s796_s8 = inlined_call_operand.vmem [shape: f32[1,128], index: 8, kind: input, shape index: {}]   ;;  %s797_s9 = inlined_call_operand.hbm [shape: f32[8,128], index: 9, kind: output, shape index: {}]  }
   0x1   :  { %15 = vsyncpa [#allocation6], 0 }
   0x2   :  { %16 = vsyncpa [#allocation9], 0  ;;  %s33_s11 = sshll.u32 %s789_s1, 4  ;;  %s34_s11 = int_to_ptr.hbm [resolvable:$true] %s33_s11 }
   0x3   :  { %17 = vsyncpa [#allocation4], 0  ;;  %s700_s12 = smov [#allocation5]   ;;  %s63_s16 = sshll.u32 %s793_s5, 4  ;;  %s64_s16 = int_to_ptr.hbm [resolvable:$true] %s63_s16 }
   0x4   :  { %s35_s13 = sshll.u32 %s700_s12, 4  ;;  %s701_s17 = smov 64   ;;  %s36_s13 = int_to_ptr.vmem [resolvable:$true] %s35_s13 }
   0x5   :  { %s702_s18 = smov 4   ;;  %s703_s19 = smov [#allocation8]  }
   0x6   :  { %41 = dma.hbm_to_vmem [thread:$0]  %s34_s11, 128, %s36_s13, [#allocation6], %s701_s17, %s701_s17, %s702_s18  }
   0x7   :  { %s65_s20 = sshll.u32 %s703_s19, 4  ;;  %s23_s23 = sshll.u32 %s788_s0, 4  ;;  %s66_s20 = int_to_ptr.vmem [resolvable:$true] %s65_s20  ;;  %s24_s23 = int_to_ptr.hbm [resolvable:$true] %s23_s23 }
   0x8   :  { %71 = dma.hbm_to_vmem [thread:$0]  %s64_s16, 1024, %s66_s20, [#allocation9], %s701_s17, %s701_s17, %s702_s18  }
   0x9   :  { %s48_s25 = sshll.u32 %s791_s3, 4  ;;  %s704_s26 = smov [#allocation2]   ;;  %s49_s25 = int_to_ptr.hbm [resolvable:$true] %s48_s25 }
   0xa   :  { %s25_s27 = sshll.u32 %s704_s26, 4  ;;  %s705_s5 = smov [#allocation7]   ;;  %s26_s27 = int_to_ptr.vmem [resolvable:$true] %s25_s27 }
   0xb   :  { %28 = dma.hbm_to_vmem [thread:$0]  %s24_s23, 128, %s26_s27, [#allocation3]  }
   0xc   :  { %s50_s28 = sshll.u32 %s705_s5, 4  ;;  %s78_s10 = sshll.u32 %s795_s7, 4  ;;  %s51_s28 = int_to_ptr.vmem [resolvable:$true] %s50_s28  ;;  %s79_s10 = int_to_ptr.hbm [resolvable:$true] %s78_s10 }
   0xd   :  { %56 = dma.hbm_to_vmem [thread:$0]  %s49_s25, 1024, %s51_s28, [#allocation6], %s701_s17, %s701_s17, %s702_s18  }
   0xe   :  { %s706_s0 = smov [#allocation10]  }
   0xf   :  { %s80_s11 = sshll.u32 %s706_s0, 4  ;;  %s81_s11 = int_to_ptr.vmem [resolvable:$true] %s80_s11 }
  0x10   :  { %86 = dma.hbm_to_vmem [thread:$0]  %s79_s10, 1024, %s81_s11, [#allocation9], %s701_s17, %s701_s17, %s702_s18  }
  0x11   :  { %692 = dma.done.wait [#allocation3], 128  }
  0x12   :  { %693 = vsyncadd [#allocation3], 4294967168 }
  0x13   :  { %694 = dma.done.wait [#allocation6], 1152  }
  0x14   :  { %695 = vsyncadd [#allocation6], 4294966144 }
  0x15   :  { %696 = dma.done.wait [#allocation9], 2048  }
  0x16   :  { %697 = vsyncadd [#allocation9], 4294965248  ;;  %v511_v0 = vld [vmem:[#allocation5] sm:$0xff]  ;;  %v110_v1 = vld [vmem:[#allocation2] sm:$0xff]  ;;  %vm124_vm0 = vcmask 130048   ;;  %s707_s16 = smov [#allocation11]  }
  0x17   :  { %v519_v2 = vld [vmem:[#allocation7 + $0x38] sm:$0xff]  ;;  %v111_v3 = vpack.c.bf16 %v110_v1, %v110_v1  ;;  %135 = vmatpush.bf16.msra.mxu0 %v511_v0  ;;  %v518_v4 = vld [vmem:[#allocation7 + $0x30] sm:$0xff]  ;;  %v517_v5 = vld [vmem:[#allocation7 + $0x28] sm:$0xff]  ;;  %s396_s17 = sshll.u32 %s707_s16, 4  ;;  %s398_s20 = sshll.u32 %s797_s9, 4  ;;  %s397_s17 = int_to_ptr.vmem [resolvable:$true] %s396_s17  ;;  %s399_s20 = int_to_ptr.hbm [resolvable:$true] %s398_s20 }
  0x18   :  { %211 = vmatpush.bf16.msra.mxu1 %v519_v2  ;;  %v516_v6 = vld [vmem:[#allocation7 + $0x20] sm:$0xff]  ;;  %v515_v7 = vld [vmem:[#allocation7 + $0x18] sm:$0xff]  ;;  %v514_v8 = vld [vmem:[#allocation7 + $0x10] sm:$0xff] }
  0x19   :  { %v513_v9 = vld [vmem:[#allocation7 + $0x8] sm:$0xff]  ;;  %v512_v10 = vld [vmem:[#allocation7] sm:$0xff]  ;;  %v527_v11 = vld [vmem:[#allocation8 + $0x38] sm:$0xff] }
  0x1a   :  { %414 = vmatmul.msk.bf16.vlgmr.msra.gmra.mxu0 %vm124_vm0, %v111_v3  ;;  %294 = vmatpush.bf16.msra.mxu2 %v527_v11  ;;  %v526_v12 = vld [vmem:[#allocation8 + $0x30] sm:$0xff]  ;;  %v525_v13 = vld [vmem:[#allocation8 + $0x28] sm:$0xff]  ;;  %v524_v14 = vld [vmem:[#allocation8 + $0x20] sm:$0xff] }
  0x1b   :  { %v523_v15 = vld [vmem:[#allocation8 + $0x18] sm:$0xff]  ;;  %v522_v16 = vld [vmem:[#allocation8 + $0x10] sm:$0xff]  ;;  %v521_v23 = vld [vmem:[#allocation8 + $0x8] sm:$0xff] }
  0x1c   :  { %212 = vmatpush.bf16.msra.mxu1 %v518_v4  ;;  %v544_v17 = vld [vmem:[%s790_s2] ss:$0 sm:$0xff]  ;;  %v520_v24 = vld [vmem:[#allocation8] sm:$0xff]  ;;  %v535_v25 = vld [vmem:[#allocation10 + $0x38] sm:$0xff] }
  0x1d   :  { %377 = vmatpush.bf16.msra.mxu3 %v535_v25  ;;  %v534_v26 = vld [vmem:[#allocation10 + $0x30] sm:$0xff]  ;;  %v533_v27 = vld [vmem:[#allocation10 + $0x28] sm:$0xff]  ;;  %v532_v28 = vld [vmem:[#allocation10 + $0x20] sm:$0xff] }
  0x1e   :  { %295 = vmatpush.bf16.msra.mxu2 %v526_v12  ;;  %v531_v29 = vld [vmem:[#allocation10 + $0x18] sm:$0xff]  ;;  %v530_v30 = vld [vmem:[#allocation10 + $0x10] sm:$0xff]  ;;  %v529_v37 = vld [vmem:[#allocation10 + $0x8] sm:$0xff] }
  0x1f   :  { %v545_v31 = vld [vmem:[%s792_s4] ss:$0 sm:$0xff]  ;;  %v528_v38 = vld [vmem:[#allocation10] sm:$0xff] }
  0x20   :  { %213 = vmatpush.bf16.msra.mxu1 %v517_v5  ;;  %v546_v39 = vld [vmem:[%s794_s6] ss:$0 sm:$0xff] }
  0x21   :  { %378 = vmatpush.bf16.msra.mxu3 %v534_v26  ;;  %v547_v45 = vld [vmem:[%s796_s8] ss:$0 sm:$0xff] }
  0x22   :  { %296 = vmatpush.bf16.msra.mxu2 %v525_v13 }
  0x24   :  { %214 = vmatpush.bf16.msra.mxu1 %v516_v6 }
  0x25   :  { %379 = vmatpush.bf16.msra.mxu3 %v533_v27 }
  0x26   :  { %297 = vmatpush.bf16.msra.mxu2 %v524_v14 }
  0x28   :  { %215 = vmatpush.bf16.msra.mxu1 %v515_v7 }
  0x29   :  { %380 = vmatpush.bf16.msra.mxu3 %v532_v28 }
  0x2a   :  { %298 = vmatpush.bf16.msra.mxu2 %v523_v15 }
  0x2c   :  { %216 = vmatpush.bf16.msra.mxu1 %v514_v8 }
  0x2d   :  { %381 = vmatpush.bf16.msra.mxu3 %v531_v29 }
  0x2e   :  { %299 = vmatpush.bf16.msra.mxu2 %v522_v16 }
  0x30   :  { %217 = vmatpush.bf16.msra.mxu1 %v513_v9 }
  0x31   :  { %382 = vmatpush.bf16.msra.mxu3 %v530_v30 }
  0x32   :  { %300 = vmatpush.bf16.msra.mxu2 %v521_v23 }
  0x34   :  { %218 = vmatpush.bf16.msra.mxu1 %v512_v10 }
  0x35   :  { %383 = vmatpush.bf16.msra.mxu3 %v529_v37 }
  0x36   :  { %301 = vmatpush.bf16.msra.mxu2 %v520_v24 }
  0x39   :  { %384 = vmatpush.bf16.msra.mxu3 %v528_v38 }
  0x97   :  { %v137_v18 = vpop.f32.mrf.mxu0 }
  0x98   :  { %v138_v19 = vadd.f32 %v544_v17, %v137_v18 }
  0x9a   :  { %v141_v20 = vmax.f32 %v138_v19, 0.0 }
  0x9c   :  { %v142_v21 = vpack.c.bf16 %v141_v20, %v141_v20 }
  0x9e   :  { %219 = vmatmul.bf16.vlgmr.msra.gmra.mxu1 %v142_v21 }
  0x9f   :  { %v139_v22 = vpop.f32.mrf.mxu0 }
 0x11b   :  { %v220_v32 = vpop.f32.mrf.mxu1 }
 0x11c   :  { %v221_v33 = vadd.f32 %v545_v31, %v220_v32 }
 0x11e   :  { %v224_v34 = vmax.f32 %v221_v33, 0.0 }
 0x120   :  { %v225_v35 = vpack.c.bf16 %v224_v34, %v224_v34 }
 0x122   :  { %302 = vmatmul.bf16.vlgmr.msra.gmra.mxu2 %v225_v35 }
 0x123   :  { %v222_v36 = vpop.f32.mrf.mxu1 }
 0x1a5   :  { %v303_v40 = vpop.f32.mrf.mxu2 }
 0x1a6   :  { %v304_v41 = vadd.f32 %v546_v39, %v303_v40 }
 0x1a8   :  { %v307_v42 = vmax.f32 %v304_v41, 0.0 }
 0x1aa   :  { %v308_v43 = vpack.c.bf16 %v307_v42, %v307_v42 }
 0x1ac   :  { %385 = vmatmul.bf16.vlgmr.msra.gmra.mxu3 %v308_v43 }
 0x1ad   :  { %v305_v44 = vpop.f32.mrf.mxu2 }
 0x22f   :  { %v386_v46 = vpop.f32.mrf.mxu3 }
 0x230   :  { %v387_v47 = vadd.f32 %v547_v45, %v386_v46 }
 0x232   :  { %390 = vst [vmem:[#allocation11] sm:$0xff] %v387_v47 }
 0x233   :  { %401 = dma.vmem_to_hbm [thread:$0]  %s397_s17, 128, %s399_s20, [#allocation4]  }
 0x237   :  { %v388_v48 = vpop.f32.mrf.mxu3 }
 0x238   :  { %698 = dma.done.wait [#allocation4], 128  }
 0x239   :  { %699 = vsyncadd [#allocation4], 4294967168 }
 0x23a   :  { %406 = vsyncpa [#allocation3], 1 }
 0x23b   :  { %407 = vsyncpa [#allocation6], 1 }
 0x23c   :  { %408 = vsyncpa [#allocation9], 1 }
 0x23d   :  { %409 = vsyncpa [#allocation4], 1 }

</bundles_post_ra>
